<compile_context>
chip_gen: v7x
topology: tpu7x:2x2x1
jax: 0.10.0
libtpu: 0.0.40
codegen_flags: <defaults>
</compile_context>

<pallas_src>
import functools

import jax
import jax.numpy as jnp
import numpy as np
from jax.experimental import pallas as pl
from jax.experimental.pallas import tpu as pltpu

HIDDEN0 = 400
HIDDEN1 = 300

LANE = 128
HIDDEN0_PAD = 512   # 400 -> 512  (multiple of 128)
HIDDEN1_PAD = 384   # 300 -> 384  (multiple of 128; sweep 512 on v6e/v7x)

MAX_TILE_B = 512    # batch-tile cap (sweepable: 256/512/1024)


def _round_up(x, m):
    return (x + m - 1) // m * m


# ----------------------------------------------------------------------------
# Kernel
# ----------------------------------------------------------------------------
def _actor_kernel(scale_ref, obs_ref, w1_ref, b1_ref, w2_ref, b2_ref,
                  w3_ref, b3_ref, out_ref):
    scale = scale_ref[0, 0]

    # fc1 + ReLU  (bf16 operands into the MXU, f32 accumulation / epilogue)
    h0 = jnp.dot(obs_ref[...], w1_ref[...],
                 preferred_element_type=jnp.float32) + b1_ref[...]
    h0 = jnp.maximum(h0, 0.0)

    # fc2 + ReLU
    h1 = jnp.dot(h0.astype(jnp.bfloat16), w2_ref[...],
                 preferred_element_type=jnp.float32) + b2_ref[...]
    h1 = jnp.maximum(h1, 0.0)

    # fc3 + tanh * scale (narrow N=output_dim store; no 128-lane padding)
    h2 = jnp.dot(h1.astype(jnp.bfloat16), w3_ref[...],
                 preferred_element_type=jnp.float32) + b3_ref[...]
    out_ref[...] = (jnp.tanh(h2) * scale).astype(out_ref.dtype)


# ----------------------------------------------------------------------------
# One-time parameter preparation (padding + bf16 cast hoisted out of the
# per-call path).
# ----------------------------------------------------------------------------
def prepare_actor_params(params, input_dim):
    """Pad raw [in, out] params to lane-aligned widths and cast weights to bf16.

    Do this ONCE (e.g. at init / after each optimizer step), not per forward.
    """
    w1, b1, w2, b2, w3, b3 = params
    in_pad = _round_up(max(input_dim, 1), LANE)
    out_dim = w3.shape[1]

    w1p = jnp.zeros((in_pad, HIDDEN0_PAD), jnp.bfloat16)
    w1p = w1p.at[:input_dim, :HIDDEN0].set(w1.astype(jnp.bfloat16))
    b1p = jnp.zeros((1, HIDDEN0_PAD), jnp.float32).at[:, :HIDDEN0].set(b1)

    w2p = jnp.zeros((HIDDEN0_PAD, HIDDEN1_PAD), jnp.bfloat16)
    w2p = w2p.at[:HIDDEN0, :HIDDEN1].set(w2.astype(jnp.bfloat16))
    b2p = jnp.zeros((1, HIDDEN1_PAD), jnp.float32).at[:, :HIDDEN1].set(b2)

    w3p = jnp.zeros((HIDDEN1_PAD, out_dim), jnp.bfloat16)
    w3p = w3p.at[:HIDDEN1, :].set(w3.astype(jnp.bfloat16))
    b3p = b3.astype(jnp.float32)

    return (w1p, b1p, w2p, b2p, w3p, b3p)


# ----------------------------------------------------------------------------
# Forward (jitted: obs pad, scale scalar, pallas_call and output slice fuse)
# ----------------------------------------------------------------------------
@jax.jit
def _actor_forward_jit(obs, scale_arr, w1p, b1p, w2p, b2p, w3p, b3p):
    batch, input_dim = obs.shape
    in_pad = w1p.shape[0]
    out_dim = w3p.shape[1]

    # Batch tiling: small batches round up to a sublane multiple (8); large
    # batches use up-to-512-row tiles so grid-step overhead is amortized and
    # the MXU gets long M runs.
    tile_b = min(MAX_TILE_B, _round_up(batch, 8))
    b_pad = _round_up(batch, tile_b)
    grid = (b_pad // tile_b,)

    # Zero-pad obs rows (batch) and columns (lane-dense fc1 LHS); exact math
    # since padded weight rows are zero.  Cast MXU LHS to bf16 once here.
    obs_p = jnp.pad(obs, ((0, b_pad - batch), (0, in_pad - input_dim)))
    obs_p = obs_p.astype(jnp.bfloat16)

    out = pl.pallas_call(
        _actor_kernel,
        out_shape=jax.ShapeDtypeStruct((b_pad, out_dim), jnp.float32),
        grid=grid,
        in_specs=[
            # runtime scale scalar lives in SMEM (no recompile when it changes)
            pl.BlockSpec(memory_space=pltpu.SMEM),
            # obs: tiled over the batch axis, lane-dense columns
            pl.BlockSpec((tile_b, in_pad), lambda i: (i, 0)),
            # weights / biases: constant block index -> DMA'd once, VMEM-resident
            pl.BlockSpec((in_pad, HIDDEN0_PAD), lambda i: (0, 0)),
            pl.BlockSpec((1, HIDDEN0_PAD), lambda i: (0, 0)),
            pl.BlockSpec((HIDDEN0_PAD, HIDDEN1_PAD), lambda i: (0, 0)),
            pl.BlockSpec((1, HIDDEN1_PAD), lambda i: (0, 0)),
            pl.BlockSpec((HIDDEN1_PAD, out_dim), lambda i: (0, 0)),
            pl.BlockSpec((1, out_dim), lambda i: (0, 0)),
        ],
        # narrow output block: last dim == full array dim (no 128-lane pad)
        out_specs=pl.BlockSpec((tile_b, out_dim), lambda i: (i, 0)),
        compiler_params=pltpu.CompilerParams(
            dimension_semantics=("parallel",),     # batch tiles independent
            vmem_limit_bytes=32 * 1024 * 1024,     # ~3-4 MB actual working set
        ),
    )(scale_arr, obs_p, w1p, b1p, w2p, b2p, w3p, b3p)

    return out[:batch]


def actor_forward(obs, prepared_params, scale=1.0):
    """obs: [B, input_dim] float32 -> [B, output_dim] float32."""
    scale_arr = jnp.full((1, 1), scale, jnp.float32)
    return _actor_forward_jit(obs, scale_arr, *prepared_params)


# ----------------------------------------------------------------------------
# Init + reference
# ----------------------------------------------------------------------------
def init_actor_params(key, input_dim, output_dim=1):
    """Deterministic init mirroring Actor.init_weights (fanin_init etc.)."""
    k1, k2, k3, kb1, kb2, kb3 = jax.random.split(key, 6)

    # fanin_init uses v = 1/sqrt(size[0]) where size = (out, in).
    v1 = 1.0 / np.sqrt(HIDDEN0)
    v2 = 1.0 / np.sqrt(HIDDEN1)
    # Stored as [in, out] (transposed from PyTorch's [out, in]).
    w1 = jax.random.uniform(k1, (input_dim, HIDDEN0), jnp.float32, -v1, v1)
    w2 = jax.random.uniform(k2, (HIDDEN0, HIDDEN1), jnp.float32, -v2, v2)
    w3 = jax.random.uniform(k3, (HIDDEN1, output_dim), jnp.float32, -0.003, 0.003)

    # Biases keep PyTorch nn.Linear default init: U(-1/sqrt(fan_in), +1/sqrt(fan_in)).
    bv1 = 1.0 / np.sqrt(input_dim)
    bv2 = 1.0 / np.sqrt(HIDDEN0)
    bv3 = 1.0 / np.sqrt(HIDDEN1)
    b1 = jax.random.uniform(kb1, (1, HIDDEN0), jnp.float32, -bv1, bv1)
    b2 = jax.random.uniform(kb2, (1, HIDDEN1), jnp.float32, -bv2, bv2)
    b3 = jax.random.uniform(kb3, (1, output_dim), jnp.float32, -bv3, bv3)

    return (w1, b1, w2, b2, w3, b3)


def actor_reference(obs, params, scale=1.0):
    """Plain-JAX f32 reference for correctness checking."""
    w1, b1, w2, b2, w3, b3 = params
    h = jnp.maximum(obs @ w1 + b1, 0.0)
    h = jnp.maximum(h @ w2 + b2, 0.0)
    return jnp.tanh(h @ w3 + b3) * scale


if __name__ == "__main__":
    key = jax.random.PRNGKey(0)
    k_param, k_obs, k_obs2 = jax.random.split(key, 3)

    input_dim = 16
    output_dim = 1
    scale = 2.0

    params = init_actor_params(k_param, input_dim, output_dim)
    prepared = prepare_actor_params(params, input_dim)       # one-time padding

    # Small-batch check (grid of 1 tile, padded batch rows).
    batch = 2
    obs = jax.random.normal(k_obs, (batch, input_dim), jnp.float32)
    out = jax.block_until_ready(actor_forward(obs, prepared, scale=scale))
    ref = actor_reference(obs, params, scale=scale)
    np.testing.assert_allclose(np.asarray(out), np.asarray(ref),
                               rtol=2e-2, atol=1e-2)
    assert out.shape == (batch, output_dim)

    # Multi-tile check (exercises grid > 1 and batch padding on the last tile).
    batch2 = 600
    obs2 = jax.random.normal(k_obs2, (batch2, input_dim), jnp.float32)
    out2 = jax.block_until_ready(actor_forward(obs2, prepared, scale=scale))
    ref2 = actor_reference(obs2, params, scale=scale)
    np.testing.assert_allclose(np.asarray(out2), np.asarray(ref2),
                               rtol=2e-2, atol=1e-2)
    assert out2.shape == (batch2, output_dim)

    print("KERNEL_OK")
</pallas_src>

<mosaic_0001>
module attributes {stable_mosaic.version = 11 : i64} {
  func.func @_actor_kernel(%arg0: i32, %arg1: memref<1x1xf32, #tpu.memory_space<smem>>, %arg2: memref<8x128xbf16, #tpu.memory_space<vmem>>, %arg3: memref<128x512xbf16, #tpu.memory_space<vmem>>, %arg4: memref<1x512xf32, #tpu.memory_space<vmem>>, %arg5: memref<512x384xbf16, #tpu.memory_space<vmem>>, %arg6: memref<1x384xf32, #tpu.memory_space<vmem>>, %arg7: memref<384x1xbf16, #tpu.memory_space<vmem>>, %arg8: memref<1x1xf32, #tpu.memory_space<vmem>>, %arg9: memref<8x1xf32, #tpu.memory_space<vmem>>) attributes {dimension_semantics = [#tpu.dimension_semantics<parallel>], iteration_bounds = array<i64: 1>, scalar_prefetch = 0 : i64, scratch_operands = 0 : i64, tpu.core_type = #tpu.core_type<tc>, window_params = [{transform_indices = @transform_0, window_bounds = array<i64: 1, 1>}, {transform_indices = @transform_1, window_bounds = array<i64: 8, 128>}, {pipeline_mode = #tpu.pipeline_mode<synchronous>, transform_indices = @transform_2, window_bounds = array<i64: 128, 512>}, {pipeline_mode = #tpu.pipeline_mode<synchronous>, transform_indices = @transform_3, window_bounds = array<i64: 1, 512>}, {pipeline_mode = #tpu.pipeline_mode<synchronous>, transform_indices = @transform_4, window_bounds = array<i64: 512, 384>}, {pipeline_mode = #tpu.pipeline_mode<synchronous>, transform_indices = @transform_5, window_bounds = array<i64: 1, 384>}, {pipeline_mode = #tpu.pipeline_mode<synchronous>, transform_indices = @transform_6, window_bounds = array<i64: 384, 1>}, {pipeline_mode = #tpu.pipeline_mode<synchronous>, transform_indices = @transform_7, window_bounds = array<i64: 1, 1>}, {transform_indices = @transform_8, window_bounds = array<i64: 8, 1>}]} {
    %c0 = arith.constant 0 : index
    %c0_0 = arith.constant 0 : index
    %0 = memref.load %arg1[%c0, %c0_0] : memref<1x1xf32, #tpu.memory_space<smem>>
    %c0_1 = arith.constant 0 : index
    %c0_2 = arith.constant 0 : index
    %1 = vector.load %arg2[%c0_1, %c0_2] : memref<8x128xbf16, #tpu.memory_space<vmem>>, vector<8x128xbf16>
    %c0_3 = arith.constant 0 : index
    %c0_4 = arith.constant 0 : index
    %2 = vector.load %arg3[%c0_3, %c0_4] : memref<128x512xbf16, #tpu.memory_space<vmem>>, vector<128x512xbf16>
    %cst = arith.constant dense<0.000000e+00> : vector<8x512xf32>
    %3 = tpu.matmul %1, %2, %cst {dimension_numbers = #tpu.dot_dimension_numbers<[1], [0], [0], [1], [0, 0, 1, 1], [], []>} : vector<8x128xbf16>, vector<128x512xbf16>, vector<8x512xf32> -> vector<8x512xf32>
    %c0_5 = arith.constant 0 : index
    %c0_6 = arith.constant 0 : index
    %4 = vector.load %arg4[%c0_5, %c0_6] : memref<1x512xf32, #tpu.memory_space<vmem>>, vector<1x512xf32>
    %5 = vector.broadcast %4 : vector<1x512xf32> to vector<8x512xf32>
    %6 = arith.addf %3, %5 : vector<8x512xf32>
    %cst_7 = arith.constant 0.000000e+00 : f32
    %7 = vector.broadcast %cst_7 : f32 to vector<8x512xf32>
    %8 = arith.maximumf %6, %7 : vector<8x512xf32>
    %9 = arith.truncf %8 : vector<8x512xf32> to vector<8x512xbf16>
    %c0_8 = arith.constant 0 : index
    %c0_9 = arith.constant 0 : index
    %10 = vector.load %arg5[%c0_8, %c0_9] : memref<512x384xbf16, #tpu.memory_space<vmem>>, vector<512x384xbf16>
    %cst_10 = arith.constant dense<0.000000e+00> : vector<8x384xf32>
    %11 = tpu.matmul %9, %10, %cst_10 {dimension_numbers = #tpu.dot_dimension_numbers<[1], [0], [0], [1], [0, 0, 1, 1], [], []>} : vector<8x512xbf16>, vector<512x384xbf16>, vector<8x384xf32> -> vector<8x384xf32>
    %c0_11 = arith.constant 0 : index
    %c0_12 = arith.constant 0 : index
    %12 = vector.load %arg6[%c0_11, %c0_12] : memref<1x384xf32, #tpu.memory_space<vmem>>, vector<1x384xf32>
    %13 = vector.broadcast %12 : vector<1x384xf32> to vector<8x384xf32>
    %14 = arith.addf %11, %13 : vector<8x384xf32>
    %cst_13 = arith.constant 0.000000e+00 : f32
    %15 = vector.broadcast %cst_13 : f32 to vector<8x384xf32>
    %16 = arith.maximumf %14, %15 : vector<8x384xf32>
    %17 = arith.truncf %16 : vector<8x384xf32> to vector<8x384xbf16>
    %c0_14 = arith.constant 0 : index
    %c0_15 = arith.constant 0 : index
    %18 = vector.load %arg7[%c0_14, %c0_15] : memref<384x1xbf16, #tpu.memory_space<vmem>>, vector<384x1xbf16>
    %cst_16 = arith.constant dense<0.000000e+00> : vector<8x1xf32>
    %19 = tpu.matmul %17, %18, %cst_16 {dimension_numbers = #tpu.dot_dimension_numbers<[1], [0], [0], [1], [0, 0, 1, 1], [], []>} : vector<8x384xbf16>, vector<384x1xbf16>, vector<8x1xf32> -> vector<8x1xf32>
    %c0_17 = arith.constant 0 : index
    %c0_18 = arith.constant 0 : index
    %20 = vector.load %arg8[%c0_17, %c0_18] : memref<1x1xf32, #tpu.memory_space<vmem>>, vector<1x1xf32>
    %21 = vector.broadcast %20 : vector<1x1xf32> to vector<8x1xf32>
    %22 = arith.addf %19, %21 : vector<8x1xf32>
    %23 = math.tanh %22 : vector<8x1xf32>
    %24 = vector.broadcast %0 : f32 to vector<8x1xf32>
    %25 = arith.mulf %23, %24 : vector<8x1xf32>
    %c0_19 = arith.constant 0 : index
    %c0_20 = arith.constant 0 : index
    %26 = vector.load %arg9[%c0_19, %c0_20] : memref<8x1xf32, #tpu.memory_space<vmem>>, vector<8x1xf32>
    tpu.vector_store %arg9[%c0_19, %c0_20], %25 {strides = array<i32>} : memref<8x1xf32, #tpu.memory_space<vmem>>, vector<8x1xf32>,
    return
  }
  func.func @transform_0(%arg0: i32) -> (i32, i32) {
    %c0_i32 = arith.constant 0 : i32
    %c0_i32_0 = arith.constant 0 : i32
    %c0_i32_1 = arith.constant 0 : i32
    return %c0_i32, %c0_i32_0 : i32, i32
  }
  func.func @transform_1(%arg0: i32) -> (i32, i32) {
    %c0_i32 = arith.constant 0 : i32
    %c0_i32_0 = arith.constant 0 : i32
    return %arg0, %c0_i32 : i32, i32
  }
  func.func @transform_2(%arg0: i32) -> (i32, i32) {
    %c0_i32 = arith.constant 0 : i32
    %c0_i32_0 = arith.constant 0 : i32
    %c0_i32_1 = arith.constant 0 : i32
    return %c0_i32, %c0_i32_0 : i32, i32
  }
  func.func @transform_3(%arg0: i32) -> (i32, i32) {
    %c0_i32 = arith.constant 0 : i32
    %c0_i32_0 = arith.constant 0 : i32
    %c0_i32_1 = arith.constant 0 : i32
    return %c0_i32, %c0_i32_0 : i32, i32
  }
  func.func @transform_4(%arg0: i32) -> (i32, i32) {
    %c0_i32 = arith.constant 0 : i32
    %c0_i32_0 = arith.constant 0 : i32
    %c0_i32_1 = arith.constant 0 : i32
    return %c0_i32, %c0_i32_0 : i32, i32
  }
  func.func @transform_5(%arg0: i32) -> (i32, i32) {
    %c0_i32 = arith.constant 0 : i32
    %c0_i32_0 = arith.constant 0 : i32
    %c0_i32_1 = arith.constant 0 : i32
    return %c0_i32, %c0_i32_0 : i32, i32
  }
  func.func @transform_6(%arg0: i32) -> (i32, i32) {
    %c0_i32 = arith.constant 0 : i32
    %c0_i32_0 = arith.constant 0 : i32
    %c0_i32_1 = arith.constant 0 : i32
    return %c0_i32, %c0_i32_0 : i32, i32
  }
  func.func @transform_7(%arg0: i32) -> (i32, i32) {
    %c0_i32 = arith.constant 0 : i32
    %c0_i32_0 = arith.constant 0 : i32
    %c0_i32_1 = arith.constant 0 : i32
    return %c0_i32, %c0_i32_0 : i32, i32
  }
  func.func @transform_8(%arg0: i32) -> (i32, i32) {
    %c0_i32 = arith.constant 0 : i32
    %c0_i32_0 = arith.constant 0 : i32
    return %arg0, %c0_i32 : i32, i32
  }
}

</mosaic_0001>

<bundles_post_ra>
// kernel: _actor_forward_jit.1
= control target key start
LH: loop header
LB: loop body
LE: loop exit
PB: predicated region body
PF: predicated region fallthrough
CT: control target
= control target key end

     0   :  { %s2187_s0 = inlined_call_operand.<no memory space> [shape: f32[1,1], index: 0, kind: input, shape index: {}]   ;;  %s2188_s1 = inlined_call_operand.vmem [shape: bf16[8,128], index: 1, kind: input, shape index: {}]   ;;  %s2189_s2 = inlined_call_operand.hbm [shape: bf16[128,512], index: 2, kind: input, shape index: {}]   ;;  %s2190_s3 = inlined_call_operand.vmem [shape: f32[1,512], index: 3, kind: input, shape index: {}]   ;;  %s2191_s4 = inlined_call_operand.hbm [shape: bf16[512,384], index: 4, kind: input, shape index: {}]   ;;  %s2192_s5 = inlined_call_operand.vmem [shape: f32[1,384], index: 5, kind: input, shape index: {}]   ;;  %s2193_s6 = inlined_call_operand.vmem [shape: bf16[384,1], index: 6, kind: input, shape index: {}]   ;;  %s2194_s7 = inlined_call_operand.<no memory space> [shape: f32[1,1], index: 7, kind: input, shape index: {}]   ;;  %s2195_s8 = inlined_call_operand.vmem [shape: f32[8,1], index: 8, kind: output, shape index: {}]  }
   0x1   :  { %v14_v0 = vstv %s2194_s7 }
   0x2   :  { %15 = vst [vmem:[#allocation3] sm:$0x1] %v14_v0 }
   0x3   :  { %16 = vsyncpa [#allocation5], 0 }
   0x4   :  { %17 = vsyncpa [#allocation7], 0  ;;  %s1995_s29 = smov [#allocation4]   ;;  %s1947_s11 = scalar_lea.hbm %s2189_s2, 4096 }
   0x5   :  { %s27_s30 = sshll.u32 %s1995_s29, 4  ;;  %p1948_p0 = scmp.ne.s32.totalorder %s2189_s2, %s1947_s11  ;;  %s28_s30 = int_to_ptr.vmem [resolvable:$true] %s27_s30 }
   0x6   :  { %p1951_p1 = scmp.lt.u32.totalorder %s1947_s11, %s2189_s2 }
   0x8   :  { %p1953_p2 = pnand %p1951_p1, %p1948_p0 }
   0xa   :  { %1956 = shalt.err (!%p1953_p2)
}
   0xb   :  { %s1957_s7 = scalar_lea.vmem %s28_s30, 4096  ;;  %p1962_p4 = scmp.lt.s32.totalorder %s28_s30, %s28_s30 }
   0xc   :  { %p1958_p3 = scmp.ne.s32.totalorder %s28_s30, %s1957_s7  ;;  %p1963_p5 = scmp.lt.s32.totalorder %s1957_s7, %s1957_s7 }
   0xe   :  { %p1964_p6 = por %p1963_p5, %p1962_p4 }
  0x10   :  { %p1965_p7 = pnand %p1964_p6, %p1958_p3 }
  0x12   :  { %1968 = shalt.err (!%p1965_p7)
}
  0x13   :  { %s1996_s16 = smov 256   ;;  %s1997_s17 = smov 16  }
  0x14   :  { %33 = dma.hbm_to_vmem [thread:$0]  %s2189_s2, 4096, %s28_s30, [#allocation5], %s1996_s16, %s1996_s16, %s1997_s17  }
  0x15   :  { %s1998_s20 = smov [#allocation6]   ;;  %s1969_s24 = scalar_lea.hbm %s2191_s4, 12288 }
  0x16   :  { %s41_s21 = sshll.u32 %s1998_s20, 4  ;;  %p1970_p8 = scmp.ne.s32.totalorder %s2191_s4, %s1969_s24  ;;  %s42_s21 = int_to_ptr.vmem [resolvable:$true] %s41_s21 }
  0x17   :  { %p1973_p9 = scmp.lt.u32.totalorder %s1969_s24, %s2191_s4 }
  0x19   :  { %p1975_p10 = pnand %p1973_p9, %p1970_p8 }
  0x1b   :  { %1978 = shalt.err (!%p1975_p10)
}
  0x1c   :  { %s1979_s29 = scalar_lea.vmem %s42_s21, 12288  ;;  %p1984_p12 = scmp.lt.s32.totalorder %s42_s21, %s42_s21 }
  0x1d   :  { %p1980_p11 = scmp.ne.s32.totalorder %s42_s21, %s1979_s29  ;;  %p1985_p13 = scmp.lt.s32.totalorder %s1979_s29, %s1979_s29 }
  0x1f   :  { %p1986_p0 = por %p1985_p13, %p1984_p12 }
  0x21   :  { %p1987_p1 = pnand %p1986_p0, %p1980_p11 }
  0x23   :  { %1990 = shalt.err (!%p1987_p1)
}
  0x24   :  { %s1999_s2 = smov 192   ;;  %s2000_s30 = smov 12  }
  0x25   :  { %47 = dma.hbm_to_vmem [thread:$0]  %s2191_s4, 12288, %s42_s21, [#allocation7], %s1999_s2, %s1999_s2, %s2000_s30  }
  0x26   :  { %1991 = dma.done.wait [#allocation5], 4096  }
  0x27   :  { %1992 = vsyncadd [#allocation5], 4294963200 }
  0x28   :  { %1993 = dma.done.wait [#allocation7], 12288  }
  0x29   :  { %1994 = vsyncadd [#allocation7], 4294955008  ;;  %v2001_v1 = vmov 0   ;;  %v1745_v2 = vld [vmem:[#allocation4 + $0x4] ss:$16 sps:$4 sm:$0xff]   ;;  %vm2003_vm0 = vmmov 0  }
  0x2a   :  { %309 = vmatprep.mubr.bf16.mxu0 %v2001_v1  ;;  %350 = vmatprep.mubr.bf16.mxu1 %v2001_v1  ;;  %v1747_v3 = vld [vmem:[#allocation4] ss:$16 sps:$4 sm:$0xff]   ;;  %v1748_v4 = vld [vmem:[#allocation4 + $0x24] ss:$16 sps:$4 sm:$0xff]   ;;  %v1769_v11 = vld [vmem:[#allocation4 + $0xc] ss:$16 sps:$4 sm:$0xff]  }
  0x2b   :  { %277 = vmatprep.subr.bf16.mxu0 %v1745_v2  ;;  %v1750_v5 = vld [vmem:[#allocation4 + $0x20] ss:$16 sps:$4 sm:$0xff]   ;;  %v1751_v6 = vld [vmem:[#allocation4 + $0x44] ss:$16 sps:$4 sm:$0xff]   ;;  %v1771_v12 = vld [vmem:[#allocation4 + $0x8] ss:$16 sps:$4 sm:$0xff]   ;;  %318 = vmatprep.subr.bf16.mxu1 %v1769_v11 }
  0x2c   :  { %278 = vmatpush1.bf16.msra.mxu0 %v1747_v3  ;;  %v1753_v7 = vld [vmem:[#allocation4 + $0x40] ss:$16 sps:$4 sm:$0xff]   ;;  %v1754_v8 = vld [vmem:[#allocation4 + $0x64] ss:$16 sps:$4 sm:$0xff]   ;;  %v1772_v13 = vld [vmem:[#allocation4 + $0x2c] ss:$16 sps:$4 sm:$0xff]   ;;  %319 = vmatpush1.bf16.msra.mxu1 %v1771_v12 }
  0x2d   :  { %279 = vmatprep.subr.bf16.mxu0 %v1748_v4  ;;  %v1756_v9 = vld [vmem:[#allocation4 + $0x60] ss:$16 sps:$4 sm:$0xff]   ;;  %v1757_v10 = vld [vmem:[#allocation4 + $0x84] ss:$16 sps:$4 sm:$0xff]   ;;  %v1774_v15 = vld [vmem:[#allocation4 + $0x28] ss:$16 sps:$4 sm:$0xff]   ;;  %320 = vmatprep.subr.bf16.mxu1 %v1772_v13 }
  0x2e   :  { %v1759_v14 = vld [vmem:[#allocation4 + $0x80] ss:$16 sps:$4 sm:$0xff]   ;;  %v1775_v16 = vld [vmem:[#allocation4 + $0x4c] ss:$16 sps:$4 sm:$0xff]   ;;  %v1760_v17 = vld [vmem:[#allocation4 + $0xa4] ss:$16 sps:$4 sm:$0xff]  }
  0x2f   :  { %v1762_v18 = vld [vmem:[#allocation4 + $0xa0] ss:$16 sps:$4 sm:$0xff]   ;;  %v1777_v19 = vld [vmem:[#allocation4 + $0x48] ss:$16 sps:$4 sm:$0xff]   ;;  %v1778_v20 = vld [vmem:[#allocation4 + $0x6c] ss:$16 sps:$4 sm:$0xff]  }
  0x30   :  { %280 = vmatpush1.bf16.msra.mxu0 %v1750_v5  ;;  %321 = vmatpush1.bf16.msra.mxu1 %v1774_v15  ;;  %v1763_v21 = vld [vmem:[#allocation4 + $0xc4] ss:$16 sps:$4 sm:$0xff]   ;;  %v1765_v22 = vld [vmem:[#allocation4 + $0xc0] ss:$16 sps:$4 sm:$0xff]   ;;  %v1780_v23 = vld [vmem:[#allocation4 + $0x68] ss:$16 sps:$4 sm:$0xff]  }
  0x31   :  { %281 = vmatprep.subr.bf16.mxu0 %v1751_v6  ;;  %322 = vmatprep.subr.bf16.mxu1 %v1775_v16  ;;  %v1781_v24 = vld [vmem:[#allocation4 + $0x8c] ss:$16 sps:$4 sm:$0xff]   ;;  %v1766_v25 = vld [vmem:[#allocation4 + $0xe4] ss:$16 sps:$4 sm:$0xff]   ;;  %v1768_v26 = vld [vmem:[#allocation4 + $0xe0] ss:$16 sps:$4 sm:$0xff]  }
  0x32   :  { %v1783_v27 = vld [vmem:[#allocation4 + $0x88] ss:$16 sps:$4 sm:$0xff]   ;;  %v1784_v28 = vld [vmem:[#allocation4 + $0xac] ss:$16 sps:$4 sm:$0xff]   ;;  %v1795_v29 = vld [vmem:[#allocation6 + $0x4] ss:$12 sps:$4 sm:$0xff]  }
  0x33   :  { %v62_v30 = vld [vmem:[%s2188_s1] sm:$0xf]  ;;  %v1786_v31 = vld [vmem:[#allocation4 + $0xa8] ss:$16 sps:$4 sm:$0xff]   ;;  %v1807_v46 = vld [vmem:[#allocation6 + $0x64] ss:$12 sps:$4 sm:$0xff]  }
  0x34   :  { %282 = vmatpush1.bf16.msra.mxu0 %v1753_v7  ;;  %323 = vmatpush1.bf16.msra.mxu1 %v1777_v19  ;;  %v1787_v32 = vld [vmem:[#allocation4 + $0xcc] ss:$16 sps:$4 sm:$0xff]   ;;  %v1789_v35 = vld [vmem:[#allocation4 + $0xc8] ss:$16 sps:$4 sm:$0xff]   ;;  %v1801_v38 = vld [vmem:[#allocation6 + $0x34] ss:$12 sps:$4 sm:$0xff]  }
  0x35   :  { %283 = vmatprep.subr.bf16.mxu0 %v1754_v8  ;;  %324 = vmatprep.subr.bf16.mxu1 %v1778_v20  ;;  %v1793_v33 = vld [vmem:[#allocation6] ss:$12 sps:$4 sm:$0xff]   ;;  %v1798_v34 = vld [vmem:[#allocation6 + $0x1c] ss:$12 sps:$4 sm:$0xff]   ;;  %v1796_v37 = vld [vmem:[#allocation6 + $0x18] ss:$12 sps:$4 sm:$0xff]  }
  0x36   :  { %v1790_v36 = vld [vmem:[#allocation4 + $0xec] ss:$16 sps:$4 sm:$0xff]   ;;  %v1792_v39 = vld [vmem:[#allocation4 + $0xe8] ss:$16 sps:$4 sm:$0xff]   ;;  %v1813_v54 = vld [vmem:[#allocation6 + $0x94] ss:$12 sps:$4 sm:$0xff]  }
  0x37   :  { %v1799_v40 = vld [vmem:[#allocation6 + $0x30] ss:$12 sps:$4 sm:$0xff]   ;;  %v1820_v41 = vld [vmem:[#allocation6 + $0xc8] ss:$12 sps:$4 sm:$0xff]   ;;  %v1804_v42 = vld [vmem:[#allocation6 + $0x4c] ss:$12 sps:$4 sm:$0xff]  }
  0x38   :  { %284 = vmatpush1.bf16.msra.mxu0 %v1756_v9  ;;  %325 = vmatpush1.bf16.msra.mxu1 %v1780_v23  ;;  %v1821_v43 = vld [vmem:[#allocation6 + $0x8] ss:$12 sps:$4 sm:$0xff]   ;;  %v1825_v45 = vld [vmem:[#allocation6 + $0xe0] ss:$12 sps:$4 sm:$0xff]   ;;  %v1830_v49 = vld [vmem:[#allocation6 + $0xf8] ss:$12 sps:$4 sm:$0xff]  }
  0x39   :  { %285 = vmatprep.subr.bf16.mxu0 %v1757_v10  ;;  %326 = vmatprep.subr.bf16.mxu1 %v1781_v24  ;;  %v1802_v44 = vld [vmem:[#allocation6 + $0x48] ss:$12 sps:$4 sm:$0xff]   ;;  %v1805_v47 = vld [vmem:[#allocation6 + $0x60] ss:$12 sps:$4 sm:$0xff]   ;;  %v1808_v51 = vld [vmem:[#allocation6 + $0x78] ss:$12 sps:$4 sm:$0xff]  }
  0x3a   :  { %v1826_v48 = vld [vmem:[#allocation6 + $0x20] ss:$12 sps:$4 sm:$0xff]   ;;  %v1810_v50 = vld [vmem:[#allocation6 + $0x7c] ss:$12 sps:$4 sm:$0xff]   ;;  %v1831_v52 = vld [vmem:[#allocation6 + $0x38] ss:$12 sps:$4 sm:$0xff]  }
  0x3b   :  { %v1835_v53 = vld [vmem:[#allocation6 + $0x110] ss:$12 sps:$4 sm:$0xff]   ;;  %v1840_v57 = vld [vmem:[#allocation6 + $0x128] ss:$12 sps:$4 sm:$0xff]   ;;  %v1816_v58 = vld [vmem:[#allocation6 + $0xac] ss:$12 sps:$4 sm:$0xff]  }
  0x3c   :  { %286 = vmatpush1.bf16.msra.mxu0 %v1759_v14  ;;  %327 = vmatpush1.bf16.msra.mxu1 %v1783_v27  ;;  %v1836_v55 = vld [vmem:[#allocation6 + $0x50] ss:$12 sps:$4 sm:$0xff]   ;;  %v1841_v59 = vld [vmem:[#allocation6 + $0x68] ss:$12 sps:$4 sm:$0xff]   ;;  %v1845_v61 = vld [vmem:[#allocation6 + $0x140] ss:$12 sps:$4 sm:$0xff]  }
  0x3d   :  { %287 = vmatprep.subr.bf16.mxu0 %v1760_v17  ;;  %328 = vmatprep.subr.bf16.mxu1 %v1784_v28  ;;  %v1811_v56 = vld [vmem:[#allocation6 + $0x90] ss:$12 sps:$4 sm:$0xff]   ;;  %v1814_v60 = vld [vmem:[#allocation6 + $0xa8] ss:$12 sps:$4 sm:$0xff]   ;;  %v1846_v63 = vld [vmem:[#allocation6 + $0x80] ss:$12 sps:$4 sm:$0xff]  }
  0x3e   :  { %v1819_v62 = vld [vmem:[#allocation6 + $0xc4] ss:$12 sps:$4 sm:$0xff]   ;;  %v1817_v0 = vld [vmem:[#allocation6 + $0xc0] ss:$12 sps:$4 sm:$0xff]   ;;  %v1824_v1 = vld [vmem:[#allocation6 + $0xdc] ss:$12 sps:$4 sm:$0xff]  }
  0x3f   :  { %v1822_v2 = vld [vmem:[#allocation6 + $0xd8] ss:$12 sps:$4 sm:$0xff]   ;;  %v1829_v3 = vld [vmem:[#allocation6 + $0xf4] ss:$12 sps:$4 sm:$0xff]   ;;  %v1827_v4 = vld [vmem:[#allocation6 + $0xf0] ss:$12 sps:$4 sm:$0xff]  }
  0x40   :  { %288 = vmatpush1.bf16.msra.mxu0 %v1762_v18  ;;  %329 = vmatpush1.bf16.msra.mxu1 %v1786_v31  ;;  %v1834_v5 = vld [vmem:[#allocation6 + $0x10c] ss:$12 sps:$4 sm:$0xff]   ;;  %v1832_v6 = vld [vmem:[#allocation6 + $0x108] ss:$12 sps:$4 sm:$0xff]   ;;  %v1839_v7 = vld [vmem:[#allocation6 + $0x124] ss:$12 sps:$4 sm:$0xff]  }
  0x41   :  { %289 = vmatprep.subr.bf16.mxu0 %v1763_v21  ;;  %330 = vmatprep.subr.bf16.mxu1 %v1787_v32  ;;  %v1837_v8 = vld [vmem:[#allocation6 + $0x120] ss:$12 sps:$4 sm:$0xff]   ;;  %v1844_v9 = vld [vmem:[#allocation6 + $0x13c] ss:$12 sps:$4 sm:$0xff]   ;;  %v1842_v10 = vld [vmem:[#allocation6 + $0x138] ss:$12 sps:$4 sm:$0xff]   ;;  %v97_v21 = vlaneseq }
  0x42   :  { %v1849_v11 = vld [vmem:[#allocation6 + $0x154] ss:$12 sps:$4 sm:$0xff]   ;;  %v1850_v12 = vld [vmem:[#allocation6 + $0x158] ss:$12 sps:$4 sm:$0xff]   ;;  %v1847_v13 = vld [vmem:[#allocation6 + $0x150] ss:$12 sps:$4 sm:$0xff]  }
  0x43   :  { %v1851_v14 = vld [vmem:[#allocation6 + $0x98] ss:$12 sps:$4 sm:$0xff]   ;;  %v1855_v16 = vld [vmem:[#allocation6 + $0x170] ss:$12 sps:$4 sm:$0xff]   ;;  %v1852_v17 = vld [vmem:[#allocation6 + $0x168] ss:$12 sps:$4 sm:$0xff]  }
  0x44   :  { %290 = vmatpush1.bf16.msra.mxu0 %v1765_v22  ;;  %331 = vmatpush1.bf16.msra.mxu1 %v1789_v35  ;;  %v1854_v15 = vld [vmem:[#allocation6 + $0x16c] ss:$12 sps:$4 sm:$0xff]   ;;  %v1856_v18 = vld [vmem:[#allocation6 + $0xb0] ss:$12 sps:$4 sm:$0xff]   ;;  %v1860_v20 = vld [vmem:[#allocation6 + $0x248] ss:$12 sps:$4 sm:$0xff]  }
  0x45   :  { %291 = vmatprep.subr.bf16.mxu0 %v1766_v25  ;;  %332 = vmatprep.subr.bf16.mxu1 %v1790_v36  ;;  %v1859_v19 = vld [vmem:[#allocation6 + $0x184] ss:$12 sps:$4 sm:$0xff]   ;;  %v2079_v22 = vshrl.u32 %v97_v21, 7  ;;  %v2085_v24 = vld [vmem:[%s2190_s3] sm:$0xf]  ;;  %vm1474_vm1 = vcmask 7168  }
  0x46   :  { %v1900_v21 = vld [vmem:[#allocation6 + $0x258] ss:$12 sps:$4 sm:$0xff]  }
  0x47   :  { %v99_v23 = vsub.s32 0, %v2079_v22  ;;  %v103_v25 = vsub.s32 1, %v2079_v22  ;;  %v111_v36 = vsub.s32 3, %v2079_v22 }
  0x48   :  { %292 = vmatpush1.bf16.msra.mxu0 %v1768_v26  ;;  %333 = vmatpush1.bf16.msra.mxu1 %v1792_v39  ;;  %v1861_v39 = vld [vmem:[#allocation6 + $0x188] ss:$12 sps:$4 sm:$0xff]  }
  0x49   :  { %1024 = vmatprep.subr.bf16.mxu0 %v1795_v29  ;;  %1635 = vmatprep.subr.bf16.mxu1 %v1820_v41  ;;  %v100_v26 = vrot.slane %v2085_v24, %v99_v23  ;;  %v104_v27 = vrot.slane %v2085_v24, %v103_v25  ;;  %v1864_v41 = vld [vmem:[#allocation6 + $0x19c] ss:$12 sps:$4 sm:$0xff]  }
  0x4b   :  { %310 = vmatmul.mubr.bf16.vlgmr.msra.gmra.mrb[0].mxu0 %v62_v30  ;;  %351 = vmatmul.mubr.bf16.vlgmr.msra.gmra.mrb[0].mxu1 %v62_v30 }
  0x4c   :  { %1025 = vmatpush1.bf16.msra.mxu0 %v1793_v33  ;;  %1636 = vmatpush3.bf16.msra.mxu1 %v1821_v43  ;;  %v112_v43 = vrot.slane %v2085_v24, %v111_v36  ;;  %v1918_v36 = vld [vmem:[#allocation6 + $0x2e8] ss:$12 sps:$4 sm:$0xff]  }
  0x4d   :  { %1026 = vmatprep.subr.bf16.mxu0 %v1798_v34  ;;  %1637 = vmatprep.subr.bf16.mxu1 %v1825_v45  ;;  %v1866_v45 = vld [vmem:[#allocation6 + $0x1a0] ss:$12 sps:$4 sm:$0xff]  }
  0x50   :  { %1027 = vmatpush1.bf16.msra.mxu0 %v1796_v37  ;;  %1638 = vmatpush3.bf16.msra.mxu1 %v1826_v48 }
  0x51   :  { %1028 = vmatprep.subr.bf16.mxu0 %v1801_v38  ;;  %1639 = vmatprep.subr.bf16.mxu1 %v1830_v49  ;;  %v1857_v38 = vld [vmem:[#allocation6 + $0x180] ss:$12 sps:$4 sm:$0xff]  }
  0x54   :  { %1029 = vmatpush1.bf16.msra.mxu0 %v1799_v40  ;;  %1640 = vmatpush3.bf16.msra.mxu1 %v1831_v52  ;;  %v1867_v52 = vld [vmem:[#allocation6 + $0x1b0] ss:$12 sps:$4 sm:$0xff]  }
  0x55   :  { %1030 = vmatprep.subr.bf16.mxu0 %v1804_v42  ;;  %1641 = vmatprep.subr.bf16.mxu1 %v1835_v53  ;;  %v1865_v42 = vld [vmem:[#allocation6 + $0x260] ss:$12 sps:$4 sm:$0xff]   ;;  %v1871_v53 = vld [vmem:[#allocation6 + $0x1b8] ss:$12 sps:$4 sm:$0xff]  }
  0x58   :  { %1031 = vmatpush1.bf16.msra.mxu0 %v1802_v44  ;;  %1642 = vmatpush3.bf16.msra.mxu1 %v1836_v55  ;;  %v1862_v44 = vld [vmem:[#allocation6 + $0x198] ss:$12 sps:$4 sm:$0xff]  }
  0x59   :  { %1032 = vmatprep.subr.bf16.mxu0 %v1807_v46  ;;  %1643 = vmatprep.subr.bf16.mxu1 %v1840_v57  ;;  %v1869_v46 = vld [vmem:[#allocation6 + $0x1b4] ss:$12 sps:$4 sm:$0xff]   ;;  %v1874_v55 = vld [vmem:[#allocation6 + $0x1cc] ss:$12 sps:$4 sm:$0xff]  }
  0x5c   :  { %1033 = vmatpush1.bf16.msra.mxu0 %v1805_v47  ;;  %1644 = vmatpush3.bf16.msra.mxu1 %v1841_v59  ;;  %v1870_v47 = vld [vmem:[#allocation6 + $0x278] ss:$12 sps:$4 sm:$0xff]   ;;  %v1872_v59 = vld [vmem:[#allocation6 + $0x1c8] ss:$12 sps:$4 sm:$0xff]  }
  0x5d   :  { %1034 = vmatprep.subr.bf16.mxu0 %v1810_v50  ;;  %1645 = vmatprep.subr.bf16.mxu1 %v1845_v61  ;;  %v1879_v61 = vld [vmem:[#allocation6 + $0x1e4] ss:$12 sps:$4 sm:$0xff]  }
  0x60   :  { %1035 = vmatpush1.bf16.msra.mxu0 %v1808_v51  ;;  %1646 = vmatpush3.bf16.msra.mxu1 %v1846_v63  ;;  %v107_v63 = vsub.s32 2, %v2079_v22  ;;  %v1938_v22 = vld [vmem:[%s2193_s6 + $0x88] sm:$0xff]  }
  0x61   :  { %1036 = vmatprep.subr.bf16.mxu0 %v1813_v54  ;;  %1647 = vmatprep.subr.bf16.mxu1 %v1850_v12  ;;  %v1894_v12 = vld [vmem:[#allocation6 + $0x22c] ss:$12 sps:$4 sm:$0xff]  }
  0x64   :  { %1037 = vmatpush1.bf16.msra.mxu0 %v1811_v56  ;;  %1648 = vmatpush3.bf16.msra.mxu1 %v1851_v14  ;;  %v1875_v56 = vld [vmem:[#allocation6 + $0x290] ss:$12 sps:$4 sm:$0xff]  }
  0x65   :  { %1038 = vmatprep.subr.bf16.mxu0 %v1816_v58  ;;  %1649 = vmatprep.subr.bf16.mxu1 %v1855_v16  ;;  %v1896_v16 = vld [vmem:[#allocation6 + $0x230] ss:$12 sps:$4 sm:$0xff]  }
  0x68   :  { %1039 = vmatpush1.bf16.msra.mxu0 %v1814_v60  ;;  %1650 = vmatpush3.bf16.msra.mxu1 %v1856_v18  ;;  %v1876_v60 = vld [vmem:[#allocation6 + $0x1d0] ss:$12 sps:$4 sm:$0xff]  }
  0x69   :  { %1040 = vmatprep.subr.bf16.mxu0 %v1819_v62  ;;  %1657 = vmatprep.subr.bf16.mxu1 %v1860_v20  ;;  %v1880_v62 = vld [vmem:[#allocation6 + $0x2a8] ss:$12 sps:$4 sm:$0xff]  }
  0x6a   :  { %v1902_v20 = vld [vmem:[#allocation6 + $0x25c] ss:$12 sps:$4 sm:$0xff]  }
  0x6c   :  { %1041 = vmatpush1.bf16.msra.mxu0 %v1817_v0  ;;  %v1877_v0 = vld [vmem:[#allocation6 + $0x1e0] ss:$12 sps:$4 sm:$0xff]  }
  0x6d   :  { %1042 = vmatprep.subr.bf16.mxu0 %v1824_v1  ;;  %v1881_v1 = vld [vmem:[#allocation6 + $0x1e8] ss:$12 sps:$4 sm:$0xff]  }
  0x70   :  { %1043 = vmatpush1.bf16.msra.mxu0 %v1822_v2  ;;  %v1884_v2 = vld [vmem:[#allocation6 + $0x1fc] ss:$12 sps:$4 sm:$0xff]  }
  0x71   :  { %1044 = vmatprep.subr.bf16.mxu0 %v1829_v3  ;;  %v1885_v3 = vld [vmem:[#allocation6 + $0x2c0] ss:$12 sps:$4 sm:$0xff]  }
  0x74   :  { %1045 = vmatpush1.bf16.msra.mxu0 %v1827_v4  ;;  %v108_v4 = vrot.slane %v2085_v24, %v107_v63  ;;  %v1905_v24 = vld [vmem:[#allocation6 + $0x274] ss:$12 sps:$4 sm:$0xff]  }
  0x75   :  { %1046 = vmatprep.subr.bf16.mxu0 %v1834_v5  ;;  %v1882_v5 = vld [vmem:[#allocation6 + $0x1f8] ss:$12 sps:$4 sm:$0xff]  }
  0x78   :  { %1047 = vmatpush1.bf16.msra.mxu0 %v1832_v6  ;;  %v1886_v6 = vld [vmem:[#allocation6 + $0x200] ss:$12 sps:$4 sm:$0xff]  }
  0x79   :  { %1048 = vmatprep.subr.bf16.mxu0 %v1839_v7  ;;  %v1889_v7 = vld [vmem:[#allocation6 + $0x214] ss:$12 sps:$4 sm:$0xff]  }
  0x7c   :  { %1049 = vmatpush1.bf16.msra.mxu0 %v1837_v8  ;;  %v1890_v8 = vld [vmem:[#allocation6 + $0x2d8] ss:$12 sps:$4 sm:$0xff]  }
  0x7d   :  { %1050 = vmatprep.subr.bf16.mxu0 %v1844_v9 }
  0x80   :  { %1051 = vmatpush1.bf16.msra.mxu0 %v1842_v10  ;;  %v1887_v10 = vld [vmem:[#allocation6 + $0x210] ss:$12 sps:$4 sm:$0xff]  }
  0x81   :  { %1052 = vmatprep.subr.bf16.mxu0 %v1849_v11  ;;  %v1891_v11 = vld [vmem:[#allocation6 + $0x218] ss:$12 sps:$4 sm:$0xff]  }
  0x84   :  { %1053 = vmatpush1.bf16.msra.mxu0 %v1847_v13  ;;  %v1895_v13 = vld [vmem:[#allocation6 + $0x2f0] ss:$12 sps:$4 sm:$0xff]  }
  0x85   :  { %1054 = vmatprep.subr.bf16.mxu0 %v1854_v15  ;;  %v1892_v15 = vld [vmem:[#allocation6 + $0x228] ss:$12 sps:$4 sm:$0xff]  }
  0x88   :  { %1055 = vmatpush1.bf16.msra.mxu0 %v1852_v17  ;;  %v1899_v17 = vld [vmem:[#allocation6 + $0x244] ss:$12 sps:$4 sm:$0xff]  }
  0x89   :  { %1065 = vmatprep.subr.bf16.mxu0 %v1859_v19  ;;  %v1897_v19 = vld [vmem:[#allocation6 + $0x240] ss:$12 sps:$4 sm:$0xff]  }
 0x11e   :  { %v311_v28 = vpop.f32.mrb[0].mxu0  ;;  %v352_v48 = vpop.f32.mrb[0].mxu1 }
 0x11f   :  { %v312_v29 = vadd.f32 %v311_v28, %v100_v26  ;;  %v313_v30 = vpop.f32.mrb[1].mxu0  ;;  %v354_v49 = vpop.f32.mrb[1].mxu1  ;;  %v353_v9 = vadd.f32 %v352_v48, %v108_v4  ;;  %v1903_v26 = vld [vmem:[#allocation6 + $0x270] ss:$12 sps:$4 sm:$0xff]   ;;  %v1906_v28 = vld [vmem:[#allocation6 + $0x288] ss:$12 sps:$4 sm:$0xff]  }
 0x120   :  { %v314_v31 = vadd.f32 %v313_v30, %v104_v27  ;;  %v315_v32 = vpop.f32.mrb[2].mxu0  ;;  %v355_v50 = vadd.f32 %v354_v49, %v112_v43  ;;  %v356_v51 = vpop.f32.mrb[2].mxu1  ;;  %v1908_v27 = vld [vmem:[#allocation6 + $0x28c] ss:$12 sps:$4 sm:$0xff]  }
 0x121   :  { %v359_v33 = vmax.f32 %v312_v29, 0.0  ;;  %v316_v34 = vpop.f32.mrb[3].mxu0  ;;  %v357_v54 = vpop.f32.mrb[3].mxu1  ;;  %v361_v14 = vmax.f32 %v353_v9, 0.0  ;;  %v1911_v29 = vld [vmem:[#allocation6 + $0x2a4] ss:$12 sps:$4 sm:$0xff]  }
 0x122   :  { %v360_v35 = vmax.f32 %v314_v31, 0.0  ;;  %v362_v57 = vmax.f32 %v355_v50, 0.0  ;;  %v1909_v30 = vld [vmem:[#allocation6 + $0x2a0] ss:$12 sps:$4 sm:$0xff]   ;;  %v1914_v31 = vld [vmem:[#allocation6 + $0x2bc] ss:$12 sps:$4 sm:$0xff]  }
 0x123   :  { %v363_v40 = vpack.c.bf16 %v359_v33, %v359_v33  ;;  %v365_v18 = vpack.c.bf16 %v361_v14, %v361_v14  ;;  %v1912_v32 = vld [vmem:[#allocation6 + $0x2b8] ss:$12 sps:$4 sm:$0xff]   ;;  %v1917_v33 = vld [vmem:[#allocation6 + $0x2d4] ss:$12 sps:$4 sm:$0xff]   ;;  %v1915_v34 = vld [vmem:[#allocation6 + $0x2d0] ss:$12 sps:$4 sm:$0xff]  }
 0x124   :  { %v364_v37 = vpack.c.bf16 %v360_v35, %v360_v35  ;;  %v366_v58 = vpack.c.bf16 %v362_v57, %v362_v57  ;;  %v1920_v35 = vld [vmem:[#allocation6 + $0x2ec] ss:$12 sps:$4 sm:$0xff]  }
 0x125   :  { %v1927_v43 = vld [vmem:[%s2193_s6 + $0x58] sm:$0xff]   ;;  %v1932_v48 = vld [vmem:[%s2193_s6 + $0x28] sm:$0xff]   ;;  %v1933_v49 = vld [vmem:[%s2193_s6 + $0x70] sm:$0xff]  }
 0x126   :  { %1056 = vmatprep.mubr.bf16.mxu0 %v364_v37  ;;  %1138 = vmatprep.mubr.bf16.mxu1 %v364_v37  ;;  %v1921_v37 = vld [vmem:[%s2193_s6 + $0x40] sm:$0xff]   ;;  %v1934_v50 = vld [vmem:[%s2193_s6 + $0x30] sm:$0xff]   ;;  %v1935_v51 = vld [vmem:[%s2193_s6 + $0x78] sm:$0xff]  }
 0x127   :  { %1057 = vmatmul.mubr.bf16.vlgmr.msra.gmra.mrb[4].mxu0 %v363_v40  ;;  %1139 = vmatmul.mubr.bf16.vlgmr.msra.gmra.mrb[4].mxu1 %v363_v40  ;;  %v1924_v40 = vld [vmem:[%s2193_s6 + $0x8] sm:$0xff]  }
 0x128   :  { %1066 = vmatpush1.bf16.msra.mxu0 %v1857_v38  ;;  %1658 = vmatpush3.bf16.msra.mxu1 %v1861_v39  ;;  %v1922_v38 = vld [vmem:[%s2193_s6] sm:$0xff]   ;;  %v1923_v39 = vld [vmem:[%s2193_s6 + $0x48] sm:$0xff]  }
 0x129   :  { %1067 = vmatprep.subr.bf16.mxu0 %v1864_v41  ;;  %1659 = vmatprep.subr.bf16.mxu1 %v1865_v42  ;;  %v1925_v41 = vld [vmem:[%s2193_s6 + $0x50] sm:$0xff]  }
 0x12a   :  { %1178 = vmatprep.mubr.bf16.mxu1 %v366_v58  ;;  %1097 = vmatprep.mubr.bf16.mxu0 %v366_v58  ;;  %v1926_v42 = vld [vmem:[%s2193_s6 + $0x10] sm:$0xff]  }
 0x12c   :  { %1068 = vmatpush1.bf16.msra.mxu0 %v1862_v44  ;;  %1660 = vmatpush3.bf16.msra.mxu1 %v1866_v45  ;;  %v1928_v44 = vld [vmem:[%s2193_s6 + $0x18] sm:$0xff]   ;;  %v1929_v45 = vld [vmem:[%s2193_s6 + $0x60] sm:$0xff]  }
 0x12d   :  { %1069 = vmatprep.subr.bf16.mxu0 %v1869_v46  ;;  %1661 = vmatprep.subr.bf16.mxu1 %v1870_v47  ;;  %v1930_v46 = vld [vmem:[%s2193_s6 + $0x20] sm:$0xff]   ;;  %v1931_v47 = vld [vmem:[%s2193_s6 + $0x68] sm:$0xff]  }
 0x130   :  { %1070 = vmatpush1.bf16.msra.mxu0 %v1867_v52  ;;  %1662 = vmatpush3.bf16.msra.mxu1 %v1871_v53  ;;  %v1936_v52 = vld [vmem:[%s2193_s6 + $0x38] sm:$0xff]   ;;  %v2002_v53 = vmov 0.0  }
 0x131   :  { %1071 = vmatprep.subr.bf16.mxu0 %v1874_v55  ;;  %1663 = vmatprep.subr.bf16.mxu1 %v1875_v56 }
 0x134   :  { %1072 = vmatpush1.bf16.msra.mxu0 %v1872_v59  ;;  %1664 = vmatpush3.bf16.msra.mxu1 %v1876_v60  ;;  %v495_v59 = vld [vmem:[%s2192_s5] sm:$0x7] }
 0x135   :  { %1073 = vmatprep.subr.bf16.mxu0 %v1879_v61  ;;  %1665 = vmatprep.subr.bf16.mxu1 %v1880_v62  ;;  %v508_v60 = vrot.slane %v495_v59, %v107_v63 }
 0x138   :  { %1074 = vmatpush1.bf16.msra.mxu0 %v1877_v0  ;;  %1666 = vmatpush3.bf16.msra.mxu1 %v1881_v1 }
 0x139   :  { %1075 = vmatprep.subr.bf16.mxu0 %v1884_v2  ;;  %1667 = vmatprep.subr.bf16.mxu1 %v1885_v3 }
 0x13c   :  { %1076 = vmatpush1.bf16.msra.mxu0 %v1882_v5  ;;  %1668 = vmatpush3.bf16.msra.mxu1 %v1886_v6  ;;  %v500_v5 = vrot.slane %v495_v59, %v99_v23  ;;  %v504_v6 = vrot.slane %v495_v59, %v103_v25  ;;  %v1939_v23 = vld [vmem:[%s2193_s6 + $0x90] sm:$0xff]   ;;  %v1940_v25 = vld [vmem:[%s2193_s6 + $0x98] sm:$0xff]  }
 0x13d   :  { %1077 = vmatprep.subr.bf16.mxu0 %v1889_v7  ;;  %1669 = vmatprep.subr.bf16.mxu1 %v1890_v8 }
 0x140   :  { %1078 = vmatpush1.bf16.msra.mxu0 %v1887_v10  ;;  %1670 = vmatpush3.bf16.msra.mxu1 %v1891_v11 }
 0x141   :  { %1079 = vmatprep.subr.bf16.mxu0 %v1894_v12  ;;  %1671 = vmatprep.subr.bf16.mxu1 %v1895_v13 }
 0x144   :  { %1080 = vmatpush1.bf16.msra.mxu0 %v1892_v15  ;;  %1672 = vmatpush3.bf16.msra.mxu1 %v1896_v16  ;;  %v1937_v15 = vld [vmem:[%s2193_s6 + $0x80] sm:$0xff]  }
 0x145   :  { %1081 = vmatprep.subr.bf16.mxu0 %v1899_v17  ;;  %1679 = vmatprep.subr.bf16.mxu1 %v1921_v37  ;;  %v1941_v17 = vld [vmem:[%s2193_s6 + $0xa0] sm:$0xff]  }
 0x147   :  { %1179 = vmatmul.mubr.bf16.vlgmr.msra.gmra.mrb[8].mxu1 %v365_v18 }
 0x148   :  { %1082 = vmatpush1.bf16.msra.mxu0 %v1897_v19  ;;  %1680 = vmatpush3.bf16.msra.mxu1 %v1922_v38  ;;  %v1943_v19 = vld [vmem:[%s2193_s6 + $0xb0] sm:$0xff]   ;;  %v1472_v38 = vstv %s2187_s0 }
 0x149   :  { %1083 = vmatprep.subr.bf16.mxu0 %v1902_v20  ;;  %1681 = vmatprep.subr.bf16.mxu1 %v1923_v39  ;;  %v1944_v20 = vld [vmem:[%s2193_s6 + $0xb8] sm:$0xff]  }
 0x14c   :  { %1084 = vmatpush1.bf16.msra.mxu0 %v1900_v21  ;;  %1682 = vmatpush3.bf16.msra.mxu1 %v1924_v40 }
 0x14d   :  { %1085 = vmatprep.subr.bf16.mxu0 %v1905_v24  ;;  %1683 = vmatprep.subr.bf16.mxu1 %v1925_v41 }
 0x150   :  { %1086 = vmatpush1.bf16.msra.mxu0 %v1903_v26  ;;  %1684 = vmatpush3.bf16.msra.mxu1 %v1926_v42 }
 0x151   :  { %1087 = vmatprep.subr.bf16.mxu0 %v1908_v27  ;;  %1685 = vmatprep.subr.bf16.mxu1 %v1927_v43 }
 0x154   :  { %1088 = vmatpush1.bf16.msra.mxu0 %v1906_v28  ;;  %1686 = vmatpush3.bf16.msra.mxu1 %v1928_v44 }
 0x155   :  { %1089 = vmatprep.subr.bf16.mxu0 %v1911_v29  ;;  %1687 = vmatprep.subr.bf16.mxu1 %v1929_v45 }
 0x158   :  { %1090 = vmatpush1.bf16.msra.mxu0 %v1909_v30  ;;  %1688 = vmatpush3.bf16.msra.mxu1 %v1930_v46 }
 0x159   :  { %1091 = vmatprep.subr.bf16.mxu0 %v1914_v31  ;;  %1689 = vmatprep.subr.bf16.mxu1 %v1931_v47  ;;  %v1610_v31 = vld [vmem:[#allocation3] ss:$0 sm:$0xff] }
 0x15c   :  { %1092 = vmatpush1.bf16.msra.mxu0 %v1912_v32  ;;  %1690 = vmatpush3.bf16.msra.mxu1 %v1932_v48 }
 0x15d   :  { %1093 = vmatprep.subr.bf16.mxu0 %v1917_v33  ;;  %1691 = vmatprep.subr.bf16.mxu1 %v1933_v49 }
 0x160   :  { %1094 = vmatpush1.bf16.msra.mxu0 %v1915_v34  ;;  %1692 = vmatpush3.bf16.msra.mxu1 %v1934_v50 }
 0x161   :  { %1095 = vmatprep.subr.bf16.mxu0 %v1920_v35  ;;  %1693 = vmatprep.subr.bf16.mxu1 %v1935_v51 }
 0x164   :  { %1096 = vmatpush1.bf16.msra.mxu0 %v1918_v36  ;;  %1694 = vmatpush3.bf16.msra.mxu1 %v1936_v52 }
 0x165   :  { %1710 = vmatprep.subr.bf16.mxu1 %v2002_v53 }
 0x167   :  { %1098 = vmatmul.mubr.bf16.vlgmr.msra.gmra.mrb[4].mxu0 %v365_v18  ;;  %v1942_v18 = vld [vmem:[%s2193_s6 + $0xa8] sm:$0xff]  }
 0x1fa   :  { %v1651_v54 = vpop.f32.mrb[4].mxu1 }
 0x1fb   :  { %v1652_v55 = vpop.f32.mrb[5].mxu1 }
 0x1fc   :  { %v1653_v56 = vadd.f32 %v1652_v55, %v1651_v54  ;;  %v1654_v57 = vpop.f32.mrb[6].mxu1 }
 0x1fd   :  { %v1655_v58 = vpop.f32.mrb[7].mxu1 }
 0x1fe   :  { %v1141_v0 = vadd.f32 %v1653_v56, %v508_v60 }
 0x21a   :  { %v1673_v61 = vpop.f32.mrb[8].mxu1 }
 0x21b   :  { %v1674_v62 = vpop.f32.mrb[9].mxu1 }
 0x21c   :  { %v1675_v1 = vadd.f32 %v1674_v62, %v1673_v61  ;;  %v1676_v2 = vpop.f32.mrb[10].mxu1 }
 0x21d   :  { %v1677_v3 = vpop.f32.mrb[11].mxu1 }
 0x21e   :  { %v1181_v4 = vadd.f32 %v1675_v1, %v1141_v0 }
 0x220   :  { %v1188_v21 = vmax.f32 %v1181_v4, 0.0 }
 0x222   :  { %v1191_v24 = vpack.c.bf16 %v1188_v21, %v1188_v21 }
 0x23a   :  { %v1099_v7 = vpop.f32.mrb[4].mxu0 }
 0x23b   :  { %v1730_v8 = vadd.f32 %v1099_v7, %v500_v5  ;;  %v1101_v9 = vpop.f32.mrb[5].mxu0 }
 0x23c   :  { %v1731_v10 = vadd.f32 %v1101_v9, %v504_v6  ;;  %v1103_v11 = vpop.f32.mrb[6].mxu0 }
 0x23d   :  { %v1186_v12 = vmax.f32 %v1730_v8, 0.0  ;;  %v1104_v63 = vpop.f32.mrb[7].mxu0 }
 0x23e   :  { %v1187_v13 = vmax.f32 %v1731_v10, 0.0 }
 0x23f   :  { %v1189_v16 = vpack.c.bf16 %v1186_v12, %v1186_v12 }
 0x240   :  { %v1190_v14 = vpack.c.bf16 %v1187_v13, %v1187_v13 }
 0x242   :  { %1423 = vmatprep.mubr.bf16.mxu1 %v1190_v14 }
 0x243   :  { %1424 = vmatmul.mubr.bf16.vlgmr.msra.gmra.mrb[12].mxu1 %v1189_v16 }
 0x244   :  { %1711 = vmatpush3.bf16.msra.mxu1 %v1937_v15  ;;  %1726 = vmatprep.mubr.msk.bf16.mxu1 %vm2003_vm0, %v2002_v53 }
 0x245   :  { %1712 = vmatprep.subr.bf16.mxu1 %v2002_v53 }
 0x248   :  { %1713 = vmatpush3.bf16.msra.mxu1 %v1938_v22 }
 0x249   :  { %1714 = vmatprep.subr.bf16.mxu1 %v2002_v53 }
 0x24c   :  { %1715 = vmatpush3.bf16.msra.mxu1 %v1939_v23 }
 0x24d   :  { %1716 = vmatprep.subr.bf16.mxu1 %v2002_v53 }
 0x250   :  { %1717 = vmatpush3.bf16.msra.mxu1 %v1940_v25 }
 0x251   :  { %1718 = vmatprep.subr.bf16.mxu1 %v2002_v53 }
 0x254   :  { %1719 = vmatpush3.bf16.msra.mxu1 %v1941_v17 }
 0x255   :  { %1720 = vmatprep.subr.bf16.mxu1 %v2002_v53 }
 0x258   :  { %1721 = vmatpush3.bf16.msra.mxu1 %v1942_v18 }
 0x259   :  { %1722 = vmatprep.subr.bf16.mxu1 %v2002_v53 }
 0x25c   :  { %1723 = vmatpush3.bf16.msra.mxu1 %v1943_v19 }
 0x25d   :  { %1724 = vmatprep.subr.bf16.mxu1 %v2002_v53 }
 0x260   :  { %1725 = vmatpush3.bf16.msra.mxu1 %v1944_v20 }
 0x263   :  { %1727 = vmatmul.mubr.bf16.vlgmr.msra.gmra.mrb[16].mxu1 %v1191_v24 }
 0x316   :  { %v1695_v26 = vpop.f32.mrb[12].mxu1 }
 0x317   :  { %v1696_v27 = vpop.f32.mrb[13].mxu1 }
 0x318   :  { %v1697_v28 = vadd.f32 %v1696_v27, %v1695_v26  ;;  %v1698_v29 = vpop.f32.mrb[14].mxu1 }
 0x319   :  { %v1699_v30 = vpop.f32.mrb[15].mxu1 }
 0x31a   :  { %v1426_v32 = vadd.f32 %v1697_v28, %v1610_v31 }
 0x336   :  { %v1465_v33 = vpop.f32.mrb[16].mxu1 }
 0x337   :  { %v1466_v34 = vadd.f32 %v1465_v33, %v1426_v32  ;;  %v1728_v35 = vpop.f32.mrb[17].mxu1 }
 0x338   :  { %v1468_v36 = vpop.f32.mrb[18].mxu1 }
 0x339   :  { %1945 = vtanh.f32 %v1466_v34  ;;  %v1729_v37 = vpop.f32.mrb[19].mxu1 }
 0x343   :  { %v1946_v39 = vpop.eup %1945 }
 0x344   :  { %v1473_v40 = vmul.f32 %v1946_v39, %v1472_v38 }
 0x346   :  { %1475 = vst.msk [vmem:[%s2195_s8] sm:$0xff] %vm1474_vm1, %v1473_v40 }
 0x347   :  { %1480 = vsyncpa [#allocation5], 1 }
 0x348   :  { %1481 = vsyncpa [#allocation7], 1 }

</bundles_post_ra>
